<compile_context>
chip_gen: v7x
topology: tpu7x:2x2x1
jax: 0.10.0
libtpu: 0.0.40
codegen_flags: <defaults>
</compile_context>

<pallas_src>
import jax
import jax.numpy as jnp
from jax.experimental import pallas as pl
from jax.experimental.pallas import tpu as pltpu


def _make_kernel(n_layers):
    """Build the kernel body for a given (static) number of dense layers."""

    def kernel(*refs):
        it = iter(refs)
        feats_ref = next(it)
        acts_ref = next(it)
        layers = []
        for i in range(n_layers):
            wf = next(it)                      # [F, H]  bf16
            wa = next(it)                      # [A, H]  bf16
            whs = [next(it) for _ in range(i)] # [H, H]  bf16, one per previous h_j
            b = next(it)                       # [1, H]  f32
            layers.append((wf, wa, whs, b))
        wqf = next(it)                         # [1, F]  f32
        wqa = next(it)                         # [1, A]  f32
        wqhs = [next(it) for _ in range(n_layers)]  # [1, H] f32
        bq_ref = next(it)                      # (1,)    f32 in SMEM
        out_ref = next(it)                     # [TB, 1] f32

        feats = feats_ref[...]                 # f32
        acts = acts_ref[...]                   # f32
        feats_bf = feats.astype(jnp.bfloat16)
        acts_bf = acts.astype(jnp.bfloat16)

        # q head: VPU multiply + lane reduction (no N=1 MXU matmul).
        q = jnp.sum(feats * wqf[...], axis=-1, keepdims=True)
        q = q + jnp.sum(acts * wqa[...], axis=-1, keepdims=True)

        hs_bf = []
        for i in range(n_layers):
            wf, wa, whs, b = layers[i]
            # DenseNet layer: concat([h_{i-1},...,h_0, feats, acts]) @ W_i
            # expressed as a sum of per-segment matmuls (no concat needed).
            z = jnp.dot(feats_bf, wf[...], preferred_element_type=jnp.float32)
            z = z + jnp.dot(acts_bf, wa[...], preferred_element_type=jnp.float32)
            for j in range(i):
                z = z + jnp.dot(hs_bf[j], whs[j][...],
                                preferred_element_type=jnp.float32)
            z = z + b[...]
            h = z * (1.0 / (1.0 + jnp.exp(-z)))          # SiLU, f32 (EUP exp)
            q = q + jnp.sum(h * wqhs[i][...], axis=-1, keepdims=True)
            hs_bf.append(h.astype(jnp.bfloat16))

        out_ref[...] = (q + bq_ref[0]).astype(out_ref.dtype)

    return kernel


def _split_params(params, f_dim, a_dim):
    """Split the torch-shaped weights into per-segment chunks.

    Layer i consumes [h_{i-1}, ..., h_0, features, actions]; its (transposed)
    weight W_i has shape [D0 + i*H, H] with rows in exactly that order.
    """
    Ws, bs, wq, bq = params
    n = len(Ws)
    H = Ws[0].shape[1]
    flat = []
    for i, (W, b) in enumerate(zip(Ws, bs)):
        flat.append(W[i * H:i * H + f_dim, :].astype(jnp.bfloat16))   # features chunk
        flat.append(W[i * H + f_dim:, :].astype(jnp.bfloat16))        # actions chunk
        for j in range(i):                                            # h_j chunks
            flat.append(W[(i - 1 - j) * H:(i - j) * H, :].astype(jnp.bfloat16))
        flat.append(b)                                                # f32 bias
    flat.append(wq[:, n * H:n * H + f_dim])                           # q: features part
    flat.append(wq[:, n * H + f_dim:])                                # q: actions part
    for j in range(n):                                                # q: h_j parts
        flat.append(wq[:, (n - 1 - j) * H:(n - j) * H])
    flat.append(bq)                                                   # (1,) scalar bias
    return flat


def critic_forward(features, actions, params, *, block_b=256):
    """Pallas implementation of CNNCriticDenseNet.forward (post-CNN part)."""
    features = jnp.asarray(features, jnp.float32)
    actions = jnp.asarray(actions, jnp.float32)
    Ws, bs, wq, bq = params
    n_layers = len(Ws)

    B, F = features.shape
    A = actions.shape[-1]

    TB = min(block_b, B)                     # batch tile (multiple of 8 for large B)
    grid_b = pl.cdiv(B, TB)
    Bp = grid_b * TB
    if Bp != B:                              # pad so the batch tile divides evenly
        features = jnp.pad(features, ((0, Bp - B), (0, 0)))
        actions = jnp.pad(actions, ((0, Bp - B), (0, 0)))

    flat_params = _split_params(params, F, A)

    def batch_spec(cols):
        return pl.BlockSpec((TB, cols), lambda i: (i, 0))

    def resident_spec(shape):
        nd = len(shape)
        return pl.BlockSpec(shape, lambda i, _nd=nd: (0,) * _nd)

    in_specs = [batch_spec(F), batch_spec(A)]
    for p in flat_params[:-1]:
        in_specs.append(resident_spec(p.shape))
    # scalar q-bias lives in SMEM
    in_specs.append(pl.BlockSpec(memory_space=pltpu.MemorySpace.SMEM))

    out = pl.pallas_call(
        _make_kernel(n_layers),
        out_shape=jax.ShapeDtypeStruct((Bp, 1), jnp.float32),
        grid=(grid_b,),
        in_specs=in_specs,
        out_specs=pl.BlockSpec((TB, 1), lambda i: (i, 0)),
        compiler_params=pltpu.CompilerParams(
            dimension_semantics=("parallel",)),
    )(features, actions, *flat_params)

    # torch: .squeeze() — for B > 1 this is exactly the trailing size-1 dim.
    # TODO(synk): torch's .squeeze() would also drop the batch dim when B == 1.
    return out[:B, 0]


def init_params(key, out_feat, action_dim, hidden_dim, n_layers):
    """Synthetic init with the same shapes as the nn.Linear layers (W stored [in, out])."""
    d0 = out_feat + action_dim
    keys = jax.random.split(key, 2 * n_layers + 2)
    Ws, bs = [], []
    in_dim = d0
    for i in range(n_layers):
        s = float(1.0 / (in_dim ** 0.5))
        Ws.append(jax.random.uniform(keys[2 * i], (in_dim, hidden_dim), jnp.float32, -s, s))
        bs.append(jax.random.uniform(keys[2 * i + 1], (1, hidden_dim), jnp.float32, -s, s))
        in_dim += hidden_dim
    s = float(1.0 / (in_dim ** 0.5))
    wq = jax.random.uniform(keys[-2], (1, in_dim), jnp.float32, -s, s)
    bq = jax.random.uniform(keys[-1], (1,), jnp.float32, -s, s)
    return (Ws, bs, wq, bq)


def _reference(features, actions, params):
    """Pure-JAX reference mirroring the kernel's numerics (bf16 matmul operands)."""
    Ws, bs, wq, bq = params
    x_in = jnp.concatenate([features, actions], axis=-1)
    for W, b in zip(Ws, bs):
        z = jnp.dot(x_in.astype(jnp.bfloat16), W.astype(jnp.bfloat16),
                    preferred_element_type=jnp.float32) + b
        h = z * (1.0 / (1.0 + jnp.exp(-z)))             # SiLU
        x_in = jnp.concatenate([h, x_in], axis=-1)      # new output goes FIRST
    return jnp.sum(x_in * wq, axis=-1) + bq[0]


if __name__ == "__main__":
    # Small shapes consistent with the module:
    # out_feat = 2 * latent_dim (static + gripper cam) + tcp(3) + target(3) + dist(1)
    latent_dim = 16
    out_feat = 2 * latent_dim + 3 + 3 + 1      # 39
    action_dim = 5
    hidden_dim = 32
    n_layers = 3
    B = 8

    key = jax.random.PRNGKey(0)
    kf, ka, kp = jax.random.split(key, 3)
    features = jax.random.normal(kf, (B, out_feat), jnp.float32)
    actions = jax.random.normal(ka, (B, action_dim), jnp.float32)
    params = init_params(kp, out_feat, action_dim, hidden_dim, n_layers)

    q = critic_forward(features, actions, params)
    jax.block_until_ready(q)

    q_ref = _reference(features, actions, params)
    assert q.shape == (B,), q.shape
    assert jnp.allclose(q, q_ref, atol=1e-3, rtol=1e-3), (q, q_ref)
    print("KERNEL_OK")
</pallas_src>

<mosaic_0001>
module attributes {stable_mosaic.version = 11 : i64} {
  func.func @kernel(%arg0: i32, %arg1: memref<8x39xf32, #tpu.memory_space<vmem>>, %arg2: memref<8x5xf32, #tpu.memory_space<vmem>>, %arg3: memref<39x32xbf16, #tpu.memory_space<vmem>>, %arg4: memref<5x32xbf16, #tpu.memory_space<vmem>>, %arg5: memref<1x32xf32, #tpu.memory_space<vmem>>, %arg6: memref<39x32xbf16, #tpu.memory_space<vmem>>, %arg7: memref<5x32xbf16, #tpu.memory_space<vmem>>, %arg8: memref<32x32xbf16, #tpu.memory_space<vmem>>, %arg9: memref<1x32xf32, #tpu.memory_space<vmem>>, %arg10: memref<39x32xbf16, #tpu.memory_space<vmem>>, %arg11: memref<5x32xbf16, #tpu.memory_space<vmem>>, %arg12: memref<32x32xbf16, #tpu.memory_space<vmem>>, %arg13: memref<32x32xbf16, #tpu.memory_space<vmem>>, %arg14: memref<1x32xf32, #tpu.memory_space<vmem>>, %arg15: memref<1x39xf32, #tpu.memory_space<vmem>>, %arg16: memref<1x5xf32, #tpu.memory_space<vmem>>, %arg17: memref<1x32xf32, #tpu.memory_space<vmem>>, %arg18: memref<1x32xf32, #tpu.memory_space<vmem>>, %arg19: memref<1x32xf32, #tpu.memory_space<vmem>>, %arg20: memref<1xf32, #tpu.memory_space<smem>>, %arg21: memref<8x1xf32, #tpu.memory_space<vmem>>) attributes {dimension_semantics = [#tpu.dimension_semantics<parallel>], iteration_bounds = array<i64: 1>, scalar_prefetch = 0 : i64, scratch_operands = 0 : i64, tpu.core_type = #tpu.core_type<tc>, window_params = [{transform_indices = @transform_0, window_bounds = array<i64: 8, 39>}, {transform_indices = @transform_1, window_bounds = array<i64: 8, 5>}, {pipeline_mode = #tpu.pipeline_mode<synchronous>, transform_indices = @transform_2, window_bounds = array<i64: 39, 32>}, {pipeline_mode = #tpu.pipeline_mode<synchronous>, transform_indices = @transform_3, window_bounds = array<i64: 5, 32>}, {pipeline_mode = #tpu.pipeline_mode<synchronous>, transform_indices = @transform_4, window_bounds = array<i64: 1, 32>}, {pipeline_mode = #tpu.pipeline_mode<synchronous>, transform_indices = @transform_5, window_bounds = array<i64: 39, 32>}, {pipeline_mode = #tpu.pipeline_mode<synchronous>, transform_indices = @transform_6, window_bounds = array<i64: 5, 32>}, {pipeline_mode = #tpu.pipeline_mode<synchronous>, transform_indices = @transform_7, window_bounds = array<i64: 32, 32>}, {pipeline_mode = #tpu.pipeline_mode<synchronous>, transform_indices = @transform_8, window_bounds = array<i64: 1, 32>}, {pipeline_mode = #tpu.pipeline_mode<synchronous>, transform_indices = @transform_9, window_bounds = array<i64: 39, 32>}, {pipeline_mode = #tpu.pipeline_mode<synchronous>, transform_indices = @transform_10, window_bounds = array<i64: 5, 32>}, {pipeline_mode = #tpu.pipeline_mode<synchronous>, transform_indices = @transform_11, window_bounds = array<i64: 32, 32>}, {pipeline_mode = #tpu.pipeline_mode<synchronous>, transform_indices = @transform_12, window_bounds = array<i64: 32, 32>}, {pipeline_mode = #tpu.pipeline_mode<synchronous>, transform_indices = @transform_13, window_bounds = array<i64: 1, 32>}, {pipeline_mode = #tpu.pipeline_mode<synchronous>, transform_indices = @transform_14, window_bounds = array<i64: 1, 39>}, {pipeline_mode = #tpu.pipeline_mode<synchronous>, transform_indices = @transform_15, window_bounds = array<i64: 1, 5>}, {pipeline_mode = #tpu.pipeline_mode<synchronous>, transform_indices = @transform_16, window_bounds = array<i64: 1, 32>}, {pipeline_mode = #tpu.pipeline_mode<synchronous>, transform_indices = @transform_17, window_bounds = array<i64: 1, 32>}, {pipeline_mode = #tpu.pipeline_mode<synchronous>, transform_indices = @transform_18, window_bounds = array<i64: 1, 32>}, {transform_indices = @transform_19, window_bounds = array<i64: 1>}, {transform_indices = @transform_20, window_bounds = array<i64: 8, 1>}]} {
    %c0 = arith.constant 0 : index
    %c0_0 = arith.constant 0 : index
    %0 = vector.load %arg1[%c0, %c0_0] : memref<8x39xf32, #tpu.memory_space<vmem>>, vector<8x39xf32>
    %c0_1 = arith.constant 0 : index
    %c0_2 = arith.constant 0 : index
    %1 = vector.load %arg2[%c0_1, %c0_2] : memref<8x5xf32, #tpu.memory_space<vmem>>, vector<8x5xf32>
    %2 = arith.truncf %0 : vector<8x39xf32> to vector<8x39xbf16>
    %3 = arith.truncf %1 : vector<8x5xf32> to vector<8x5xbf16>
    %c0_3 = arith.constant 0 : index
    %c0_4 = arith.constant 0 : index
    %4 = vector.load %arg15[%c0_3, %c0_4] : memref<1x39xf32, #tpu.memory_space<vmem>>, vector<1x39xf32>
    %5 = vector.broadcast %4 : vector<1x39xf32> to vector<8x39xf32>
    %6 = arith.mulf %0, %5 : vector<8x39xf32>
    %cst = arith.constant dense<0.000000e+00> : vector<8xf32>
    %7 = vector.multi_reduction <add>, %6, %cst [1] : vector<8x39xf32> to vector<8xf32>
    %8 = vector.shape_cast %7 : vector<8xf32> to vector<8x1xf32>
    %c0_5 = arith.constant 0 : index
    %c0_6 = arith.constant 0 : index
    %9 = vector.load %arg16[%c0_5, %c0_6] : memref<1x5xf32, #tpu.memory_space<vmem>>, vector<1x5xf32>
    %10 = vector.broadcast %9 : vector<1x5xf32> to vector<8x5xf32>
    %11 = arith.mulf %1, %10 : vector<8x5xf32>
    %cst_7 = arith.constant dense<0.000000e+00> : vector<8xf32>
    %12 = vector.multi_reduction <add>, %11, %cst_7 [1] : vector<8x5xf32> to vector<8xf32>
    %13 = vector.shape_cast %12 : vector<8xf32> to vector<8x1xf32>
    %14 = arith.addf %8, %13 : vector<8x1xf32>
    %c0_8 = arith.constant 0 : index
    %c0_9 = arith.constant 0 : index
    %15 = vector.load %arg3[%c0_8, %c0_9] : memref<39x32xbf16, #tpu.memory_space<vmem>>, vector<39x32xbf16>
    %cst_10 = arith.constant dense<0.000000e+00> : vector<8x32xf32>
    %16 = tpu.matmul %2, %15, %cst_10 {dimension_numbers = #tpu.dot_dimension_numbers<[1], [0], [0], [1], [0, 0, 1, 1], [], []>} : vector<8x39xbf16>, vector<39x32xbf16>, vector<8x32xf32> -> vector<8x32xf32>
    %c0_11 = arith.constant 0 : index
    %c0_12 = arith.constant 0 : index
    %17 = vector.load %arg4[%c0_11, %c0_12] : memref<5x32xbf16, #tpu.memory_space<vmem>>, vector<5x32xbf16>
    %cst_13 = arith.constant dense<0.000000e+00> : vector<8x32xf32>
    %18 = tpu.matmul %3, %17, %cst_13 {dimension_numbers = #tpu.dot_dimension_numbers<[1], [0], [0], [1], [0, 0, 1, 1], [], []>} : vector<8x5xbf16>, vector<5x32xbf16>, vector<8x32xf32> -> vector<8x32xf32>
    %19 = arith.addf %16, %18 : vector<8x32xf32>
    %c0_14 = arith.constant 0 : index
    %c0_15 = arith.constant 0 : index
    %20 = vector.load %arg5[%c0_14, %c0_15] : memref<1x32xf32, #tpu.memory_space<vmem>>, vector<1x32xf32>
    %21 = vector.broadcast %20 : vector<1x32xf32> to vector<8x32xf32>
    %22 = arith.addf %19, %21 : vector<8x32xf32>
    %cst_16 = arith.constant 0.000000e+00 : f32
    %23 = vector.broadcast %cst_16 : f32 to vector<8x32xf32>
    %24 = arith.subf %23, %22 : vector<8x32xf32>
    %25 = math.exp %24 : vector<8x32xf32>
    %cst_17 = arith.constant 1.000000e+00 : f32
    %26 = vector.broadcast %cst_17 : f32 to vector<8x32xf32>
    %27 = arith.addf %26, %25 : vector<8x32xf32>
    %cst_18 = arith.constant 1.000000e+00 : f32
    %28 = vector.broadcast %cst_18 : f32 to vector<8x32xf32>
    %29 = arith.divf %28, %27 : vector<8x32xf32>
    %30 = arith.mulf %22, %29 : vector<8x32xf32>
    %c0_19 = arith.constant 0 : index
    %c0_20 = arith.constant 0 : index
    %31 = vector.load %arg17[%c0_19, %c0_20] : memref<1x32xf32, #tpu.memory_space<vmem>>, vector<1x32xf32>
    %32 = vector.broadcast %31 : vector<1x32xf32> to vector<8x32xf32>
    %33 = arith.mulf %30, %32 : vector<8x32xf32>
    %cst_21 = arith.constant dense<0.000000e+00> : vector<8xf32>
    %34 = vector.multi_reduction <add>, %33, %cst_21 [1] : vector<8x32xf32> to vector<8xf32>
    %35 = vector.shape_cast %34 : vector<8xf32> to vector<8x1xf32>
    %36 = arith.addf %14, %35 : vector<8x1xf32>
    %37 = arith.truncf %30 : vector<8x32xf32> to vector<8x32xbf16>
    %c0_22 = arith.constant 0 : index
    %c0_23 = arith.constant 0 : index
    %38 = vector.load %arg6[%c0_22, %c0_23] : memref<39x32xbf16, #tpu.memory_space<vmem>>, vector<39x32xbf16>
    %cst_24 = arith.constant dense<0.000000e+00> : vector<8x32xf32>
    %39 = tpu.matmul %2, %38, %cst_24 {dimension_numbers = #tpu.dot_dimension_numbers<[1], [0], [0], [1], [0, 0, 1, 1], [], []>} : vector<8x39xbf16>, vector<39x32xbf16>, vector<8x32xf32> -> vector<8x32xf32>
    %c0_25 = arith.constant 0 : index
    %c0_26 = arith.constant 0 : index
    %40 = vector.load %arg7[%c0_25, %c0_26] : memref<5x32xbf16, #tpu.memory_space<vmem>>, vector<5x32xbf16>
    %cst_27 = arith.constant dense<0.000000e+00> : vector<8x32xf32>
    %41 = tpu.matmul %3, %40, %cst_27 {dimension_numbers = #tpu.dot_dimension_numbers<[1], [0], [0], [1], [0, 0, 1, 1], [], []>} : vector<8x5xbf16>, vector<5x32xbf16>, vector<8x32xf32> -> vector<8x32xf32>
    %42 = arith.addf %39, %41 : vector<8x32xf32>
    %c0_28 = arith.constant 0 : index
    %c0_29 = arith.constant 0 : index
    %43 = vector.load %arg8[%c0_28, %c0_29] : memref<32x32xbf16, #tpu.memory_space<vmem>>, vector<32x32xbf16>
    %cst_30 = arith.constant dense<0.000000e+00> : vector<8x32xf32>
    %44 = tpu.matmul %37, %43, %cst_30 {dimension_numbers = #tpu.dot_dimension_numbers<[1], [0], [0], [1], [0, 0, 1, 1], [], []>} : vector<8x32xbf16>, vector<32x32xbf16>, vector<8x32xf32> -> vector<8x32xf32>
    %45 = arith.addf %42, %44 : vector<8x32xf32>
    %c0_31 = arith.constant 0 : index
    %c0_32 = arith.constant 0 : index
    %46 = vector.load %arg9[%c0_31, %c0_32] : memref<1x32xf32, #tpu.memory_space<vmem>>, vector<1x32xf32>
    %47 = vector.broadcast %46 : vector<1x32xf32> to vector<8x32xf32>
    %48 = arith.addf %45, %47 : vector<8x32xf32>
    %cst_33 = arith.constant 0.000000e+00 : f32
    %49 = vector.broadcast %cst_33 : f32 to vector<8x32xf32>
    %50 = arith.subf %49, %48 : vector<8x32xf32>
    %51 = math.exp %50 : vector<8x32xf32>
    %cst_34 = arith.constant 1.000000e+00 : f32
    %52 = vector.broadcast %cst_34 : f32 to vector<8x32xf32>
    %53 = arith.addf %52, %51 : vector<8x32xf32>
    %cst_35 = arith.constant 1.000000e+00 : f32
    %54 = vector.broadcast %cst_35 : f32 to vector<8x32xf32>
    %55 = arith.divf %54, %53 : vector<8x32xf32>
    %56 = arith.mulf %48, %55 : vector<8x32xf32>
    %c0_36 = arith.constant 0 : index
    %c0_37 = arith.constant 0 : index
    %57 = vector.load %arg18[%c0_36, %c0_37] : memref<1x32xf32, #tpu.memory_space<vmem>>, vector<1x32xf32>
    %58 = vector.broadcast %57 : vector<1x32xf32> to vector<8x32xf32>
    %59 = arith.mulf %56, %58 : vector<8x32xf32>
    %cst_38 = arith.constant dense<0.000000e+00> : vector<8xf32>
    %60 = vector.multi_reduction <add>, %59, %cst_38 [1] : vector<8x32xf32> to vector<8xf32>
    %61 = vector.shape_cast %60 : vector<8xf32> to vector<8x1xf32>
    %62 = arith.addf %36, %61 : vector<8x1xf32>
    %63 = arith.truncf %56 : vector<8x32xf32> to vector<8x32xbf16>
    %c0_39 = arith.constant 0 : index
    %c0_40 = arith.constant 0 : index
    %64 = vector.load %arg10[%c0_39, %c0_40] : memref<39x32xbf16, #tpu.memory_space<vmem>>, vector<39x32xbf16>
    %cst_41 = arith.constant dense<0.000000e+00> : vector<8x32xf32>
    %65 = tpu.matmul %2, %64, %cst_41 {dimension_numbers = #tpu.dot_dimension_numbers<[1], [0], [0], [1], [0, 0, 1, 1], [], []>} : vector<8x39xbf16>, vector<39x32xbf16>, vector<8x32xf32> -> vector<8x32xf32>
    %c0_42 = arith.constant 0 : index
    %c0_43 = arith.constant 0 : index
    %66 = vector.load %arg11[%c0_42, %c0_43] : memref<5x32xbf16, #tpu.memory_space<vmem>>, vector<5x32xbf16>
    %cst_44 = arith.constant dense<0.000000e+00> : vector<8x32xf32>
    %67 = tpu.matmul %3, %66, %cst_44 {dimension_numbers = #tpu.dot_dimension_numbers<[1], [0], [0], [1], [0, 0, 1, 1], [], []>} : vector<8x5xbf16>, vector<5x32xbf16>, vector<8x32xf32> -> vector<8x32xf32>
    %68 = arith.addf %65, %67 : vector<8x32xf32>
    %c0_45 = arith.constant 0 : index
    %c0_46 = arith.constant 0 : index
    %69 = vector.load %arg12[%c0_45, %c0_46] : memref<32x32xbf16, #tpu.memory_space<vmem>>, vector<32x32xbf16>
    %cst_47 = arith.constant dense<0.000000e+00> : vector<8x32xf32>
    %70 = tpu.matmul %37, %69, %cst_47 {dimension_numbers = #tpu.dot_dimension_numbers<[1], [0], [0], [1], [0, 0, 1, 1], [], []>} : vector<8x32xbf16>, vector<32x32xbf16>, vector<8x32xf32> -> vector<8x32xf32>
    %71 = arith.addf %68, %70 : vector<8x32xf32>
    %c0_48 = arith.constant 0 : index
    %c0_49 = arith.constant 0 : index
    %72 = vector.load %arg13[%c0_48, %c0_49] : memref<32x32xbf16, #tpu.memory_space<vmem>>, vector<32x32xbf16>
    %cst_50 = arith.constant dense<0.000000e+00> : vector<8x32xf32>
    %73 = tpu.matmul %63, %72, %cst_50 {dimension_numbers = #tpu.dot_dimension_numbers<[1], [0], [0], [1], [0, 0, 1, 1], [], []>} : vector<8x32xbf16>, vector<32x32xbf16>, vector<8x32xf32> -> vector<8x32xf32>
    %74 = arith.addf %71, %73 : vector<8x32xf32>
    %c0_51 = arith.constant 0 : index
    %c0_52 = arith.constant 0 : index
    %75 = vector.load %arg14[%c0_51, %c0_52] : memref<1x32xf32, #tpu.memory_space<vmem>>, vector<1x32xf32>
    %76 = vector.broadcast %75 : vector<1x32xf32> to vector<8x32xf32>
    %77 = arith.addf %74, %76 : vector<8x32xf32>
    %cst_53 = arith.constant 0.000000e+00 : f32
    %78 = vector.broadcast %cst_53 : f32 to vector<8x32xf32>
    %79 = arith.subf %78, %77 : vector<8x32xf32>
    %80 = math.exp %79 : vector<8x32xf32>
    %cst_54 = arith.constant 1.000000e+00 : f32
    %81 = vector.broadcast %cst_54 : f32 to vector<8x32xf32>
    %82 = arith.addf %81, %80 : vector<8x32xf32>
    %cst_55 = arith.constant 1.000000e+00 : f32
    %83 = vector.broadcast %cst_55 : f32 to vector<8x32xf32>
    %84 = arith.divf %83, %82 : vector<8x32xf32>
    %85 = arith.mulf %77, %84 : vector<8x32xf32>
    %c0_56 = arith.constant 0 : index
    %c0_57 = arith.constant 0 : index
    %86 = vector.load %arg19[%c0_56, %c0_57] : memref<1x32xf32, #tpu.memory_space<vmem>>, vector<1x32xf32>
    %87 = vector.broadcast %86 : vector<1x32xf32> to vector<8x32xf32>
    %88 = arith.mulf %85, %87 : vector<8x32xf32>
    %cst_58 = arith.constant dense<0.000000e+00> : vector<8xf32>
    %89 = vector.multi_reduction <add>, %88, %cst_58 [1] : vector<8x32xf32> to vector<8xf32>
    %90 = vector.shape_cast %89 : vector<8xf32> to vector<8x1xf32>
    %91 = arith.addf %62, %90 : vector<8x1xf32>
    %c0_59 = arith.constant 0 : index
    %92 = memref.load %arg20[%c0_59] : memref<1xf32, #tpu.memory_space<smem>>
    %93 = vector.broadcast %92 : f32 to vector<8x1xf32>
    %94 = arith.addf %91, %93 : vector<8x1xf32>
    %c0_60 = arith.constant 0 : index
    %c0_61 = arith.constant 0 : index
    %95 = vector.load %arg21[%c0_60, %c0_61] : memref<8x1xf32, #tpu.memory_space<vmem>>, vector<8x1xf32>
    tpu.vector_store %arg21[%c0_60, %c0_61], %94 {strides = array<i32>} : memref<8x1xf32, #tpu.memory_space<vmem>>, vector<8x1xf32>,
    return
  }
  func.func @transform_0(%arg0: i32) -> (i32, i32) {
    %c0_i32 = arith.constant 0 : i32
    %c0_i32_0 = arith.constant 0 : i32
    return %arg0, %c0_i32 : i32, i32
  }
  func.func @transform_1(%arg0: i32) -> (i32, i32) {
    %c0_i32 = arith.constant 0 : i32
    %c0_i32_0 = arith.constant 0 : i32
    return %arg0, %c0_i32 : i32, i32
  }
  func.func @transform_2(%arg0: i32) -> (i32, i32) {
    %c0_i32 = arith.constant 0 : i32
    %c0_i32_0 = arith.constant 0 : i32
    %c0_i32_1 = arith.constant 0 : i32
    return %c0_i32, %c0_i32_0 : i32, i32
  }
  func.func @transform_3(%arg0: i32) -> (i32, i32) {
    %c0_i32 = arith.constant 0 : i32
    %c0_i32_0 = arith.constant 0 : i32
    %c0_i32_1 = arith.constant 0 : i32
    return %c0_i32, %c0_i32_0 : i32, i32
  }
  func.func @transform_4(%arg0: i32) -> (i32, i32) {
    %c0_i32 = arith.constant 0 : i32
    %c0_i32_0 = arith.constant 0 : i32
    %c0_i32_1 = arith.constant 0 : i32
    return %c0_i32, %c0_i32_0 : i32, i32
  }
  func.func @transform_5(%arg0: i32) -> (i32, i32) {
    %c0_i32 = arith.constant 0 : i32
    %c0_i32_0 = arith.constant 0 : i32
    %c0_i32_1 = arith.constant 0 : i32
    return %c0_i32, %c0_i32_0 : i32, i32
  }
  func.func @transform_6(%arg0: i32) -> (i32, i32) {
    %c0_i32 = arith.constant 0 : i32
    %c0_i32_0 = arith.constant 0 : i32
    %c0_i32_1 = arith.constant 0 : i32
    return %c0_i32, %c0_i32_0 : i32, i32
  }
  func.func @transform_7(%arg0: i32) -> (i32, i32) {
    %c0_i32 = arith.constant 0 : i32
    %c0_i32_0 = arith.constant 0 : i32
    %c0_i32_1 = arith.constant 0 : i32
    return %c0_i32, %c0_i32_0 : i32, i32
  }
  func.func @transform_8(%arg0: i32) -> (i32, i32) {
    %c0_i32 = arith.constant 0 : i32
    %c0_i32_0 = arith.constant 0 : i32
    %c0_i32_1 = arith.constant 0 : i32
    return %c0_i32, %c0_i32_0 : i32, i32
  }
  func.func @transform_9(%arg0: i32) -> (i32, i32) {
    %c0_i32 = arith.constant 0 : i32
    %c0_i32_0 = arith.constant 0 : i32
    %c0_i32_1 = arith.constant 0 : i32
    return %c0_i32, %c0_i32_0 : i32, i32
  }
  func.func @transform_10(%arg0: i32) -> (i32, i32) {
    %c0_i32 = arith.constant 0 : i32
    %c0_i32_0 = arith.constant 0 : i32
    %c0_i32_1 = arith.constant 0 : i32
    return %c0_i32, %c0_i32_0 : i32, i32
  }
  func.func @transform_11(%arg0: i32) -> (i32, i32) {
    %c0_i32 = arith.constant 0 : i32
    %c0_i32_0 = arith.constant 0 : i32
    %c0_i32_1 = arith.constant 0 : i32
    return %c0_i32, %c0_i32_0 : i32, i32
  }
  func.func @transform_12(%arg0: i32) -> (i32, i32) {
    %c0_i32 = arith.constant 0 : i32
    %c0_i32_0 = arith.constant 0 : i32
    %c0_i32_1 = arith.constant 0 : i32
    return %c0_i32, %c0_i32_0 : i32, i32
  }
  func.func @transform_13(%arg0: i32) -> (i32, i32) {
    %c0_i32 = arith.constant 0 : i32
    %c0_i32_0 = arith.constant 0 : i32
    %c0_i32_1 = arith.constant 0 : i32
    return %c0_i32, %c0_i32_0 : i32, i32
  }
  func.func @transform_14(%arg0: i32) -> (i32, i32) {
    %c0_i32 = arith.constant 0 : i32
    %c0_i32_0 = arith.constant 0 : i32
    %c0_i32_1 = arith.constant 0 : i32
    return %c0_i32, %c0_i32_0 : i32, i32
  }
  func.func @transform_15(%arg0: i32) -> (i32, i32) {
    %c0_i32 = arith.constant 0 : i32
    %c0_i32_0 = arith.constant 0 : i32
    %c0_i32_1 = arith.constant 0 : i32
    return %c0_i32, %c0_i32_0 : i32, i32
  }
  func.func @transform_16(%arg0: i32) -> (i32, i32) {
    %c0_i32 = arith.constant 0 : i32
    %c0_i32_0 = arith.constant 0 : i32
    %c0_i32_1 = arith.constant 0 : i32
    return %c0_i32, %c0_i32_0 : i32, i32
  }
  func.func @transform_17(%arg0: i32) -> (i32, i32) {
    %c0_i32 = arith.constant 0 : i32
    %c0_i32_0 = arith.constant 0 : i32
    %c0_i32_1 = arith.constant 0 : i32
    return %c0_i32, %c0_i32_0 : i32, i32
  }
  func.func @transform_18(%arg0: i32) -> (i32, i32) {
    %c0_i32 = arith.constant 0 : i32
    %c0_i32_0 = arith.constant 0 : i32
    %c0_i32_1 = arith.constant 0 : i32
    return %c0_i32, %c0_i32_0 : i32, i32
  }
  func.func @transform_19(%arg0: i32) -> i32 {
    %c0_i32 = arith.constant 0 : i32
    %c0_i32_0 = arith.constant 0 : i32
    return %c0_i32 : i32
  }
  func.func @transform_20(%arg0: i32) -> (i32, i32) {
    %c0_i32 = arith.constant 0 : i32
    %c0_i32_0 = arith.constant 0 : i32
    return %arg0, %c0_i32 : i32, i32
  }
}

</mosaic_0001>

<bundles_post_ra>
// kernel: tpu_custom_call.1
= control target key start
LH: loop header
LB: loop body
LE: loop exit
PB: predicated region body
PF: predicated region fallthrough
CT: control target
= control target key end

     0   :  { %vm105_vm0 = vcmask 1041408   ;;  %vm106_vm1 = vcmask 1042432   ;;  %v861_v0 = vmov 0.0   ;;  %v862_v2 = vmov 65535   ;;  %s1121_s3 = inlined_call_operand.vmem [shape: bf16[5,32], index: 3, kind: input, shape index: {}]   ;;  %s1122_s1 = inlined_call_operand.vmem [shape: f32[8,5], index: 1, kind: input, shape index: {}]   ;;  %s1123_s2 = inlined_call_operand.vmem [shape: bf16[39,32], index: 2, kind: input, shape index: {}]   ;;  %s1124_s0 = inlined_call_operand.vmem [shape: f32[8,39], index: 0, kind: input, shape index: {}]   ;;  %s1125_s6 = inlined_call_operand.vmem [shape: bf16[5,32], index: 6, kind: input, shape index: {}]   ;;  %s1126_s5 = inlined_call_operand.vmem [shape: bf16[39,32], index: 5, kind: input, shape index: {}]   ;;  %s1127_s7 = inlined_call_operand.vmem [shape: bf16[32,32], index: 7, kind: input, shape index: {}]   ;;  %s1128_s14 = inlined_call_operand.vmem [shape: f32[1,39], index: 14, kind: input, shape index: {}]   ;;  %s1129_s15 = inlined_call_operand.vmem [shape: f32[1,5], index: 15, kind: input, shape index: {}]   ;;  %s1130_s9 = inlined_call_operand.vmem [shape: bf16[39,32], index: 9, kind: input, shape index: {}]   ;;  %s1131_s11 = inlined_call_operand.vmem [shape: bf16[32,32], index: 11, kind: input, shape index: {}]   ;;  %s1132_s4 = inlined_call_operand.vmem [shape: f32[1,32], index: 4, kind: input, shape index: {}]   ;;  %s1133_s10 = inlined_call_operand.vmem [shape: bf16[5,32], index: 10, kind: input, shape index: {}]   ;;  %s1134_s16 = inlined_call_operand.vmem [shape: f32[1,32], index: 16, kind: input, shape index: {}]   ;;  %s1135_s12 = inlined_call_operand.vmem [shape: bf16[32,32], index: 12, kind: input, shape index: {}]   ;;  %s1136_s8 = inlined_call_operand.vmem [shape: f32[1,32], index: 8, kind: input, shape index: {}]   ;;  %s1137_s17 = inlined_call_operand.vmem [shape: f32[1,32], index: 17, kind: input, shape index: {}]   ;;  %s1138_s13 = inlined_call_operand.vmem [shape: f32[1,32], index: 13, kind: input, shape index: {}]   ;;  %s1139_s18 = inlined_call_operand.vmem [shape: f32[1,32], index: 18, kind: input, shape index: {}]   ;;  %s1140_s19 = inlined_call_operand.<no memory space> [shape: f32[1], index: 19, kind: input, shape index: {}]   ;;  %s1141_s20 = inlined_call_operand.vmem [shape: f32[8,1], index: 20, kind: output, shape index: {}]  }
   0x1   :  { %1143 = sst [smem:[#allocation3_spill]] %s1121_s3  ;;  %759 = vmatprep.subr.bf16.mxu1 %v861_v0  ;;  %v107_v3 = vsel %vm105_vm0, 4294967295, %v862_v2  ;;  %775 = vmatprep.subr.bf16.mxu0 %v861_v0  ;;  %vm863_vm2 = vmmov 0   ;;  %vm91_vm3 = vcmask 39936   ;;  %vm170_vm4 = vcmask 1043456   ;;  %v837_v18 = vld [vmem:[%s1126_s5] sm:$0xff]  }
   0x2   :  { %1144 = sst [smem:[#allocation4_spill]] %s1122_s1  ;;  %s1148_s23 = sld [smem:[#allocation3_spill]]  ;;  %v975_v4 = vsel %vm106_vm1, %v107_v3, 0  ;;  %761 = vmatprep.mubr.msk.bf16.mxu1 %vm863_vm2, %v861_v0  ;;  %777 = vmatprep.mubr.msk.bf16.mxu0 %vm863_vm2, %v861_v0  ;;  %v171_v9 = vsel %vm106_vm1, 4294967295, %v862_v2  ;;  %vm79_vm5 = vcmask 318464   ;;  %v838_v19 = vld [vmem:[%s1126_s5 + $0x8] sm:$0xff]  }
   0x3   :  { %1145 = sst [smem:[#allocation5_spill]] %s1123_s2  ;;  %s1149_s25 = sld [smem:[#allocation4_spill]]  ;;  %v172_v12 = vsel %vm170_vm4, %v171_v9, 0  ;;  %v839_v20 = vld [vmem:[%s1126_s5 + $0x10] ss:$0 sps:$4 sm:$0xff]   ;;  %v840_v22 = vld [vmem:[%s1127_s7] sm:$0xff]  }
   0x4   :  { %1146 = sst [smem:[#allocation6_spill]] %s1124_s0  ;;  %s1150_s27 = sld [smem:[#allocation5_spill]]  ;;  %v310_v21 = vand.u32 %v839_v20, %v172_v12  ;;  %v700_v23 = vld [vmem:[%s1128_s14] ss:$0 sm:$0xff]  ;;  %v841_v26 = vld [vmem:[%s1127_s7 + $0x8] sm:$0xff]   ;;  %vm239_vm6 = vcmask 261120  }
   0x5   :  { %1147 = sst [smem:[#allocation7_spill]] %s1125_s6  ;;  %s1151_s1 = sld [smem:[#allocation6_spill]]  ;;  %v701_v27 = vld [vmem:[%s1129_s15] ss:$0 sm:$0xff]  ;;  %v843_v31 = vld [vmem:[%s1130_s9 + $0x8] sm:$0xff]   ;;  %vm694_vm7 = vcmask 7168  }
   0x6   :  { %s1152_s24 = sld [smem:[#allocation7_spill]]  ;;  %v842_v30 = vld [vmem:[%s1130_s9] sm:$0xff]   ;;  %v845_v32 = vld [vmem:[%s1130_s9 + $0x10] ss:$0 sps:$4 sm:$0xff]   ;;  %v846_v58 = vld [vmem:[%s1131_s11 + $0x8] sm:$0xff]  }
   0x7   :  { %v505_v33 = vand.u32 %v845_v32, %v172_v12  ;;  %v707_v39 = vld [vmem:[%s1132_s4] ss:$0 sm:$0xff] }
   0x8   :  { %v101_v1 = vld [vmem:[%s1148_s23] sm:$0x7] }
   0x9   :  { %v68_v5 = vld [vmem:[%s1149_s25] sm:$0xff]  ;;  %v110_v6 = vand.u32 %v975_v4, %v101_v1 }
   0xa   :  { %v985_v7 = vpack.c.bf16 %v68_v5, %v68_v5  ;;  %v834_v8 = vld [vmem:[%s1150_s27] sm:$0xff]   ;;  %v835_v10 = vld [vmem:[%s1150_s27 + $0x8] sm:$0xff]   ;;  %v836_v11 = vld [vmem:[%s1150_s27 + $0x10] ss:$0 sps:$4 sm:$0xff]   ;;  %v90_v28 = vmul.f32 %v701_v27, %v68_v5 }
   0xb   :  { %760 = vmatpush3.bf16.msra.mxu1 %v110_v6  ;;  %v174_v13 = vand.u32 %v836_v11, %v172_v12  ;;  %v67_v14 = vld [vmem:[%s1151_s1] sm:$0xff] }
   0xc   :  { %765 = vmatprep.subr.bf16.mxu1 %v861_v0  ;;  %v69_v15 = vpack.c.bf16 %v67_v14, %v67_v14  ;;  %v250_v16 = vld [vmem:[%s1152_s24] sm:$0x7]  ;;  %v78_v24 = vmul.f32 %v700_v23, %v67_v14  ;;  %v92_v29 = vsel %vm91_vm3, %v90_v28, 0.0 }
   0xd   :  { %v252_v17 = vand.u32 %v250_v16, %v975_v4  ;;  %v445_v49 = vld [vmem:[%s1133_s10] sm:$0x7] }
   0xe   :  { %762 = vmatmul.mubr.msk.bf16.vlgmr.msra.gmra.mrb[0].mxu1 %vm91_vm3, %v985_v7  ;;  %v80_v25 = vsel %vm79_vm5, %v78_v24, 0.0  ;;  %v708_v51 = vld [vmem:[%s1134_s16] ss:$0 sm:$0xff]  ;;  %v447_v53 = vand.u32 %v445_v49, %v975_v4 }
   0xf   :  { %766 = vmatpush3.bf16.msra.mxu1 %v834_v8  ;;  %771 = vmatprep.mubr.msk.bf16.mxu1 %vm863_vm2, %v861_v0  ;;  %v844_v57 = vld [vmem:[%s1131_s11] sm:$0xff]  }
  0x10   :  { %767 = vmatprep.subr.bf16.mxu1 %v861_v0  ;;  %776 = vmatpush3.bf16.msra.mxu0 %v252_v17  ;;  %v847_v9 = vld [vmem:[%s1135_s12] sm:$0xff]  }
  0x11   :  { %781 = vmatprep.subr.bf16.mxu0 %v861_v0  ;;  %81 = vadd.xlane.f32.xlu0 %v80_v25  ;;  %v717_v12 = vld [vmem:[%s1136_s8] ss:$0 sm:$0xff] }
  0x12   :  { %v718_v32 = vld [vmem:[%s1137_s17] ss:$0 sm:$0xff] }
  0x13   :  { %768 = vmatpush3.bf16.msra.mxu1 %v835_v10  ;;  %778 = vmatmul.mubr.msk.bf16.vlgmr.msra.gmra.mrb[0].mxu0 %vm91_vm3, %v985_v7  ;;  %v848_v10 = vld [vmem:[%s1135_s12 + $0x8] sm:$0xff]   ;;  %v731_v49 = vld [vmem:[%s1139_s18] ss:$0 sm:$0xff] }
  0x14   :  { %769 = vmatprep.subr.bf16.mxu1 %v861_v0  ;;  %782 = vmatpush3.bf16.msra.mxu0 %v837_v18 }
  0x15   :  { %787 = vmatprep.mubr.msk.bf16.mxu0 %vm863_vm2, %v861_v0  ;;  %783 = vmatprep.subr.bf16.mxu0 %v861_v0 }
  0x16   :  { %93 = vadd.xlane.f32.xlu0 %v92_v29 }
  0x17   :  { %770 = vmatpush3.bf16.msra.mxu1 %v174_v13 }
  0x18   :  { %791 = vmatprep.subr.bf16.mxu1 %v861_v0  ;;  %784 = vmatpush3.bf16.msra.mxu0 %v838_v19 }
  0x19   :  { %785 = vmatprep.subr.bf16.mxu0 %v861_v0 }
  0x1a   :  { %772 = vmatmul.mubr.msk.bf16.vlgmr.msra.gmra.mrb[4].mxu1 %vm79_vm5, %v69_v15 }
  0x1b   :  { %795 = vmatprep.mubr.msk.bf16.mxu1 %vm863_vm2, %v861_v0  ;;  %792 = vmatpush3.bf16.msra.mxu1 %v840_v22 }
  0x1c   :  { %786 = vmatpush3.bf16.msra.mxu0 %v310_v21  ;;  %793 = vmatprep.subr.bf16.mxu1 %v861_v0 }
  0x1d   :  { %805 = vmatprep.subr.bf16.mxu0 %v861_v0 }
  0x1f   :  { %788 = vmatmul.mubr.msk.bf16.vlgmr.msra.gmra.mrb[4].mxu0 %vm79_vm5, %v69_v15  ;;  %794 = vmatpush3.bf16.msra.mxu1 %v841_v26 }
  0x20   :  { %811 = vmatprep.mubr.msk.bf16.mxu0 %vm863_vm2, %v861_v0  ;;  %799 = vmatprep.subr.bf16.mxu1 %v861_v0 }
  0x21   :  { %806 = vmatpush3.bf16.msra.mxu0 %v842_v30 }
  0x22   :  { %807 = vmatprep.subr.bf16.mxu0 %v861_v0 }
  0x25   :  { %808 = vmatpush3.bf16.msra.mxu0 %v843_v31 }
  0x26   :  { %809 = vmatprep.subr.bf16.mxu0 %v861_v0 }
  0x29   :  { %810 = vmatpush3.bf16.msra.mxu0 %v505_v33 }
  0x2a   :  { %823 = vmatprep.subr.bf16.mxu0 %v861_v0 }
  0x2c   :  { %812 = vmatmul.mubr.msk.bf16.vlgmr.msra.gmra.mrb[8].mxu0 %vm79_vm5, %v69_v15 }
  0x2d   :  { %827 = vmatprep.mubr.msk.bf16.mxu0 %vm863_vm2, %v861_v0  ;;  %824 = vmatpush3.bf16.msra.mxu0 %v847_v9 }
  0x2e   :  { %825 = vmatprep.subr.bf16.mxu0 %v861_v0 }
  0x31   :  { %826 = vmatpush3.bf16.msra.mxu0 %v848_v10 }
  0xe1   :  { %v146_v34 = vpop.f32.mrb[0].mxu1 }
  0xe2   :  { %v763_v35 = vpop.f32.mrb[1].mxu1 }
  0xe3   :  { %v149_v36 = vpop.f32.mrb[2].mxu1 }
  0xe4   :  { %v764_v37 = vpop.f32.mrb[3].mxu1 }
  0xe6   :  { %v288_v59 = vpop.f32.mrb[0].mxu0 }
  0xe7   :  { %v779_v60 = vpop.f32.mrb[1].mxu0 }
  0xe8   :  { %v291_v61 = vpop.f32.mrb[2].mxu0  ;;  %v692_v60 = vstv %s1140_s19 }
  0xe9   :  { %v780_v62 = vpop.f32.mrb[3].mxu0 }
  0xed   :  { %v210_v38 = vpop.f32.mrb[4].mxu1 }
  0xee   :  { %v211_v40 = vadd.f32 %v210_v38, %v146_v34  ;;  %v773_v41 = vpop.f32.mrb[5].mxu1  ;;  %v730_v38 = vld [vmem:[%s1138_s13] ss:$0 sm:$0xff] }
  0xef   :  { %v213_v42 = vpop.f32.mrb[6].mxu1 }
  0xf0   :  { %v223_v43 = vadd.f32 %v707_v39, %v211_v40  ;;  %v774_v44 = vpop.f32.mrb[7].mxu1 }
  0xf2   :  { %v224_v45 = vsub.f32 0.0, %v223_v43  ;;  %v346_v63 = vpop.f32.mrb[4].mxu0 }
  0xf3   :  { %v347_v1 = vadd.f32 %v346_v63, %v288_v59  ;;  %v789_v2 = vpop.f32.mrb[5].mxu0 }
  0xf4   :  { %v225_v46 = vmul.f32 1.442695, %v224_v45  ;;  %v349_v3 = vpop.f32.mrb[6].mxu0 }
  0xf5   :  { %v790_v4 = vpop.f32.mrb[7].mxu0 }
  0xf6   :  { %849 = vpow2.f32 %v225_v46 }
  0xff   :  { %v541_v5 = vpop.f32.mrb[8].mxu0 }
 0x100   :  { %v850_v47 = vpop.eup %849  ;;  %v813_v6 = vpop.f32.mrb[9].mxu0 }
 0x101   :  { %v227_v48 = vadd.f32 1.0, %v850_v47 }
 0x103   :  { %851 = vrcp.f32 %v227_v48 }
 0x10d   :  { %v852_v50 = vpop.eup %851 }
 0x10e   :  { %v230_v52 = vmul.f32 %v852_v50, %v223_v43 }
 0x110   :  { %v244_v54 = vpack.c.bf16 %v230_v52, %v230_v52  ;;  %v238_v55 = vmul.f32 %v708_v51, %v230_v52 }
 0x112   :  { %796 = vmatmul.mubr.msk.bf16.vlgmr.msra.gmra.mrb[8].mxu1 %vm239_vm6, %v244_v54  ;;  %v240_v56 = vsel %vm239_vm6, %v238_v55, 0.0 }
 0x113   :  { %241 = vadd.xlane.f32.xlu1 %v240_v56  ;;  %800 = vmatpush3.bf16.msra.mxu1 %v447_v53  ;;  %v82_v53 = vpop.xlane.xlu0 %81 }
 0x114   :  { %801 = vmatprep.mubr.msk.bf16.mxu1 %vm863_vm2, %v861_v0  ;;  %815 = vmatprep.subr.bf16.mxu1 %v861_v0 }
 0x11a   :  { %802 = vmatmul.mubr.msk.bf16.vlgmr.msra.gmra.mrb[12].mxu1 %vm91_vm3, %v985_v7  ;;  %v544_v7 = vpop.f32.mrb[10].mxu0 }
 0x11b   :  { %816 = vmatpush3.bf16.msra.mxu1 %v844_v57  ;;  %819 = vmatprep.mubr.msk.bf16.mxu1 %vm863_vm2, %v861_v0  ;;  %v814_v8 = vpop.f32.mrb[11].mxu0 }
 0x11c   :  { %817 = vmatprep.subr.bf16.mxu1 %v861_v0 }
 0x11f   :  { %818 = vmatpush3.bf16.msra.mxu1 %v846_v58 }
 0x122   :  { %820 = vmatmul.mubr.msk.bf16.vlgmr.msra.gmra.mrb[16].mxu1 %vm239_vm6, %v244_v54  ;;  %v94_v54 = vpop.xlane.xlu0 %93 }
 0x123   :  { %v95_v56 = vadd.f32 %v94_v54, %v82_v53 }
 0x1a0   :  { %v242_v55 = vpop.xlane.xlu1 %241 }
 0x1a1   :  { %v243_v58 = vadd.f32 %v242_v55, %v95_v56 }
 0x1e5   :  { %v405_v11 = vpop.f32.mrb[8].mxu1 }
 0x1e6   :  { %v411_v13 = vadd.f32 %v405_v11, %v347_v1  ;;  %v797_v14 = vpop.f32.mrb[9].mxu1 }
 0x1e7   :  { %v408_v15 = vpop.f32.mrb[10].mxu1 }
 0x1e8   :  { %v419_v16 = vadd.f32 %v717_v12, %v411_v13  ;;  %v798_v17 = vpop.f32.mrb[11].mxu1 }
 0x1ea   :  { %v420_v18 = vsub.f32 0.0, %v419_v16 }
 0x1ec   :  { %v421_v19 = vmul.f32 1.442695, %v420_v18 }
 0x1ed   :  { %v483_v20 = vpop.f32.mrb[12].mxu1 }
 0x1ee   :  { %853 = vpow2.f32 %v421_v19  ;;  %v803_v0 = vpop.f32.mrb[13].mxu1  ;;  %v542_v21 = vadd.f32 %v541_v5, %v483_v20 }
 0x1ef   :  { %v486_v22 = vpop.f32.mrb[14].mxu1 }
 0x1f0   :  { %v804_v23 = vpop.f32.mrb[15].mxu1 }
 0x1f5   :  { %v597_v24 = vpop.f32.mrb[16].mxu1 }
 0x1f6   :  { %v603_v25 = vadd.f32 %v597_v24, %v542_v21  ;;  %v821_v26 = vpop.f32.mrb[17].mxu1 }
 0x1f7   :  { %v600_v27 = vpop.f32.mrb[18].mxu1 }
 0x1f8   :  { %v854_v28 = vpop.eup %853  ;;  %v822_v29 = vpop.f32.mrb[19].mxu1 }
 0x1f9   :  { %v423_v30 = vadd.f32 1.0, %v854_v28 }
 0x1fb   :  { %855 = vrcp.f32 %v423_v30 }
 0x205   :  { %v856_v31 = vpop.eup %855 }
 0x206   :  { %v426_v33 = vmul.f32 %v856_v31, %v419_v16 }
 0x208   :  { %v439_v34 = vpack.c.bf16 %v426_v33, %v426_v33  ;;  %v434_v35 = vmul.f32 %v718_v32, %v426_v33 }
 0x20a   :  { %828 = vmatmul.mubr.msk.bf16.vlgmr.msra.gmra.mrb[12].mxu0 %vm239_vm6, %v439_v34  ;;  %v435_v36 = vsel %vm239_vm6, %v434_v35, 0.0 }
 0x20b   :  { %436 = vadd.xlane.f32.xlu1 %v435_v36 }
 0x298   :  { %v437_v57 = vpop.xlane.xlu1 %436 }
 0x299   :  { %v438_v59 = vadd.f32 %v437_v57, %v243_v58 }
 0x2dd   :  { %v657_v37 = vpop.f32.mrb[12].mxu0 }
 0x2de   :  { %v663_v39 = vadd.f32 %v657_v37, %v603_v25  ;;  %v829_v40 = vpop.f32.mrb[13].mxu0 }
 0x2df   :  { %v660_v41 = vpop.f32.mrb[14].mxu0 }
 0x2e0   :  { %v671_v42 = vadd.f32 %v730_v38, %v663_v39  ;;  %v830_v43 = vpop.f32.mrb[15].mxu0 }
 0x2e2   :  { %v672_v44 = vsub.f32 0.0, %v671_v42 }
 0x2e4   :  { %v673_v45 = vmul.f32 1.442695, %v672_v44 }
 0x2e6   :  { %857 = vpow2.f32 %v673_v45 }
 0x2f0   :  { %v858_v46 = vpop.eup %857 }
 0x2f1   :  { %v675_v47 = vadd.f32 1.0, %v858_v46 }
 0x2f3   :  { %859 = vrcp.f32 %v675_v47 }
 0x2fd   :  { %v860_v48 = vpop.eup %859 }
 0x2fe   :  { %v678_v50 = vmul.f32 %v860_v48, %v671_v42 }
 0x300   :  { %v686_v51 = vmul.f32 %v731_v49, %v678_v50 }
 0x302   :  { %v687_v52 = vsel %vm239_vm6, %v686_v51, 0.0 }
 0x303   :  { %688 = vadd.xlane.f32.xlu0 %v687_v52 }
 0x390   :  { %v689_v61 = vpop.xlane.xlu0 %688 }
 0x391   :  { %v690_v62 = vadd.f32 %v689_v61, %v438_v59 }
 0x393   :  { %v693_v63 = vadd.f32 %v692_v60, %v690_v62 }
 0x395   :  { %695 = vst.msk [vmem:[%s1141_s20] sm:$0xff] %vm694_vm7, %v693_v63 }

</bundles_post_ra>
